<compile_context>
chip_gen: v5e
topology: v5e:2x2
jax: 0.10.0
libtpu: 0.0.40
codegen_flags: <defaults>
</compile_context>

<pallas_src>
import functools
from typing import NamedTuple

import jax
import jax.numpy as jnp
from jax import lax
from jax.experimental import pallas as pl
from jax.experimental.pallas import tpu as pltpu


def _round_up(x, m):
    return ((x + m - 1) // m) * m


def _cdiv(a, b):
    return (a + b - 1) // b


def _vmem_budget_bytes():
    """Generation-aware VMEM budget with headroom below physical capacity."""
    try:
        cap = pltpu.get_tpu_info().vmem_capacity_bytes  # 128 MiB v5e/v6e, 64 MiB v7x
    except Exception:
        cap = 64 << 20  # conservative fallback (safe on all generations)
    return int(max(min(cap * 3 // 4, 96 << 20), 16 << 20))


class _Plan(NamedTuple):
    B: int
    K: int
    N: int
    tm: int
    tn: int
    tk: int          # 0 => K untiled (single K slab per grid step)
    B_pad: int
    K_pad: int
    N_pad: int
    vmem_limit: int


def make_plan(B, K, N, *, tm_max=256, tn_max=512, tk_max=1024):
    budget = _vmem_budget_bytes()

    # N (output) tiling: lane-aligned (multiple of 128), balanced tiles.
    N_pad128 = _round_up(N, 128)
    n_n = max(_cdiv(N_pad128, tn_max), 1)
    tn = _round_up(_cdiv(N_pad128, n_n), 128)
    N_pad = tn * n_n

    # Batch tiling: sublane-aligned, balanced (avoid round-up-to-tm waste);
    # prefer >= 2 tiles so the parallel batch axis can shard across TCs (v7x).
    n_b = max(_cdiv(B, tm_max), 1)
    if n_b == 1 and B >= 16:
        n_b = 2
    tm = _round_up(_cdiv(B, n_b), 8)
    B_pad = tm * n_b

    # K handling: untiled while the double-buffered bf16 x/w slabs + f32
    # output tile fit the VMEM budget; otherwise block K.
    K_pad = _round_up(K, 128)

    def untiled_bytes(k_elems):
        # 2 buffers each for x (bf16), w (bf16), out (f32) + bias + slack.
        return (2 * 2 * (tm + tn) * k_elems + 2 * 4 * tm * tn
                + 4 * N_pad + (1 << 20))

    if untiled_bytes(K_pad) <= budget:
        tk = 0
        vmem_limit = min(max(untiled_bytes(K_pad) * 2, 16 << 20), budget)
    else:
        tk = min(_round_up(tk_max, 128), K_pad)
        while tk > 128 and (2 * 2 * (tm + tn) * tk + 3 * 4 * tm * tn
                            + 4 * N_pad + (1 << 20)) > budget:
            tk -= 128
        K_pad = _round_up(K, tk)
        vmem_limit = min(max((2 * 2 * (tm + tn) * tk + 3 * 4 * tm * tn) * 2,
                             16 << 20), budget)

    return _Plan(B, K, N, tm, tn, tk, B_pad, K_pad, N_pad, int(vmem_limit))


def prepare_params(weight, bias, plan):
    """One-time parameter prep (pad + cast); keep this OUT of the hot path."""
    w_p = jnp.pad(weight, ((0, plan.N_pad - plan.N), (0, plan.K_pad - plan.K))
                  ).astype(jnp.bfloat16)
    b_p = jnp.pad(bias, (0, plan.N_pad - plan.N)
                  ).reshape(1, plan.N_pad).astype(jnp.float32)
    return w_p, b_p


def _fused_kernel(x_ref, w_ref, b_ref, o_ref):
    # x_ref: (tm, K_pad) bf16; w_ref: (tn, K_pad) bf16 in PyTorch (out, in)
    # layout (no host-side transpose); b_ref: (1, tn) f32; o_ref: (tm, tn) f32.
    y = lax.dot_general(
        x_ref[...], w_ref[...],
        dimension_numbers=(((1,), (1,)), ((), ())),
        preferred_element_type=jnp.float32,
    ) + b_ref[...]
    o_ref[...] = (y * y * y).astype(o_ref.dtype)


def _ktiled_kernel(x_ref, w_ref, b_ref, o_ref, acc_ref):
    k = pl.program_id(2)

    @pl.when(k == 0)
    def _():
        acc_ref[...] = jnp.zeros_like(acc_ref)

    acc_ref[...] += lax.dot_general(
        x_ref[...], w_ref[...],
        dimension_numbers=(((1,), (1,)), ((), ())),
        preferred_element_type=jnp.float32,
    )

    @pl.when(k == pl.num_programs(2) - 1)
    def _():
        y = acc_ref[...] + b_ref[...]
        o_ref[...] = (y * y * y).astype(o_ref.dtype)


@functools.partial(jax.jit, static_argnames=("plan",))
def nonlinear_classifier_fwd(x, w_p, b_p, plan):
    B, K, N = plan.B, plan.K, plan.N
    tm, tn, tk = plan.tm, plan.tn, plan.tk
    B_pad, K_pad, N_pad = plan.B_pad, plan.K_pad, plan.N_pad

    # Hot-path padding of activations only; weights/bias were pre-padded.
    x_p = x
    if (B_pad, K_pad) != (B, K):
        x_p = jnp.pad(x, ((0, B_pad - B), (0, K_pad - K)))
    x_p = x_p.astype(jnp.bfloat16)

    n_n, n_b = N_pad // tn, B_pad // tm
    flops = 2 * B_pad * K_pad * N_pad + 3 * B_pad * N_pad

    if tk == 0:
        # Grid (N-tiles, B-tiles): batch innermost => weight tile (j, 0) is
        # held in VMEM across the whole batch sweep (fetched once per n-tile).
        bytes_accessed = (2 * n_n * B_pad * K_pad   # x streamed once per n-tile
                          + 2 * N_pad * K_pad       # weight streamed once
                          + 4 * N_pad
                          + 4 * B_pad * N_pad)
        out_p = pl.pallas_call(
            _fused_kernel,
            out_shape=jax.ShapeDtypeStruct((B_pad, N_pad), jnp.float32),
            grid_spec=pltpu.PrefetchScalarGridSpec(
                num_scalar_prefetch=0,
                grid=(n_n, n_b),
                in_specs=[
                    pl.BlockSpec((tm, K_pad), lambda j, i: (i, 0)),   # x
                    pl.BlockSpec((tn, K_pad), lambda j, i: (j, 0)),   # weight
                    pl.BlockSpec((1, tn), lambda j, i: (0, j)),       # bias
                ],
                out_specs=pl.BlockSpec((tm, tn), lambda j, i: (i, j)),
            ),
            compiler_params=pltpu.CompilerParams(
                dimension_semantics=("parallel", "parallel"),
                vmem_limit_bytes=plan.vmem_limit,
            ),
            cost_estimate=pl.CostEstimate(
                flops=flops, transcendentals=0, bytes_accessed=bytes_accessed),
        )(x_p, w_p, b_p)
    else:
        # Large in_dim: innermost K reduction axis + f32 VMEM accumulator.
        n_k = K_pad // tk
        bytes_accessed = (2 * n_n * B_pad * K_pad
                          + 2 * n_b * N_pad * K_pad
                          + 4 * N_pad
                          + 4 * B_pad * N_pad)
        out_p = pl.pallas_call(
            _ktiled_kernel,
            out_shape=jax.ShapeDtypeStruct((B_pad, N_pad), jnp.float32),
            grid_spec=pltpu.PrefetchScalarGridSpec(
                num_scalar_prefetch=0,
                grid=(n_n, n_b, n_k),
                in_specs=[
                    pl.BlockSpec((tm, tk), lambda j, i, k: (i, k)),   # x
                    pl.BlockSpec((tn, tk), lambda j, i, k: (j, k)),   # weight
                    pl.BlockSpec((1, tn), lambda j, i, k: (0, j)),    # bias
                ],
                out_specs=pl.BlockSpec((tm, tn), lambda j, i, k: (i, j)),
                scratch_shapes=[pltpu.VMEM((tm, tn), jnp.float32)],
            ),
            compiler_params=pltpu.CompilerParams(
                dimension_semantics=("parallel", "parallel", "arbitrary"),
                vmem_limit_bytes=plan.vmem_limit,
            ),
            cost_estimate=pl.CostEstimate(
                flops=flops, transcendentals=0, bytes_accessed=bytes_accessed),
        )(x_p, w_p, b_p)

    if (B_pad, N_pad) != (B, N):
        out_p = out_p[:B, :N]
    return out_p


def nonlinear_classifier(x, weight, bias):
    """Convenience one-shot wrapper: (x @ weight.T + bias) ** 3."""
    plan = make_plan(x.shape[0], weight.shape[1], weight.shape[0])
    w_p, b_p = prepare_params(weight, bias, plan)
    return nonlinear_classifier_fwd(x, w_p, b_p, plan)


if __name__ == "__main__":
    key = jax.random.PRNGKey(0)
    k_x, k_w, k_b = jax.random.split(key, 3)

    B, in_dim, out_dim = 8, 32, 16

    # nn.Linear default init followed by the module's reset_parameters() * 0.001.
    bound = 1.0 / (in_dim ** 0.5)
    weight = jax.random.uniform(k_w, (out_dim, in_dim), jnp.float32,
                                minval=-bound, maxval=bound) * 0.001
    bias = jax.random.uniform(k_b, (out_dim,), jnp.float32,
                              minval=-bound, maxval=bound) * 0.001
    x = jax.random.normal(k_x, (B, in_dim), jnp.float32)

    plan = make_plan(B, in_dim, out_dim)
    w_p, b_p = prepare_params(weight, bias, plan)   # one-time, outside hot path
    out = nonlinear_classifier_fwd(x, w_p, b_p, plan)
    out = jax.block_until_ready(out)

    # Reference: same bf16 rounding of the MXU inputs, f32 accumulation.
    x_r = x.astype(jnp.bfloat16).astype(jnp.float32)
    w_r = weight.astype(jnp.bfloat16).astype(jnp.float32)
    ref = (x_r @ w_r.T + bias) ** 3

    assert out.shape == (B, out_dim)
    assert out.dtype == jnp.float32
    assert jnp.allclose(out, ref, rtol=5e-3, atol=1e-12), (
        "mismatch vs reference: max abs diff "
        f"{float(jnp.max(jnp.abs(out - ref)))}")

    print("KERNEL_OK")
</pallas_src>

<mosaic_0001>
module attributes {stable_mosaic.version = 11 : i64} {
  func.func @_fused_kernel(%arg0: i32, %arg1: i32, %arg2: memref<8x128xbf16, #tpu.memory_space<vmem>>, %arg3: memref<128x128xbf16, #tpu.memory_space<vmem>>, %arg4: memref<1x128xf32, #tpu.memory_space<vmem>>, %arg5: memref<8x128xf32, #tpu.memory_space<vmem>>) attributes {dimension_semantics = [#tpu.dimension_semantics<parallel>, #tpu.dimension_semantics<parallel>], iteration_bounds = array<i64: 1, 1>, scalar_prefetch = 0 : i64, scratch_operands = 0 : i64, tpu.core_type = #tpu.core_type<tc>, window_params = [{transform_indices = @transform_0, window_bounds = array<i64: 8, 128>}, {transform_indices = @transform_1, window_bounds = array<i64: 128, 128>}, {transform_indices = @transform_2, window_bounds = array<i64: 1, 128>}, {transform_indices = @transform_3, window_bounds = array<i64: 8, 128>}]} {
    %c0 = arith.constant 0 : index
    %c0_0 = arith.constant 0 : index
    %0 = vector.load %arg2[%c0, %c0_0] : memref<8x128xbf16, #tpu.memory_space<vmem>>, vector<8x128xbf16>
    %c0_1 = arith.constant 0 : index
    %c0_2 = arith.constant 0 : index
    %1 = vector.load %arg3[%c0_1, %c0_2] : memref<128x128xbf16, #tpu.memory_space<vmem>>, vector<128x128xbf16>
    %cst = arith.constant dense<0.000000e+00> : vector<8x128xf32>
    %2 = tpu.matmul %0, %1, %cst {dimension_numbers = #tpu.dot_dimension_numbers<[1], [1], [0], [0], [0, 0, 1, 0], [], []>} : vector<8x128xbf16>, vector<128x128xbf16>, vector<8x128xf32> -> vector<8x128xf32>
    %c0_3 = arith.constant 0 : index
    %c0_4 = arith.constant 0 : index
    %3 = vector.load %arg4[%c0_3, %c0_4] : memref<1x128xf32, #tpu.memory_space<vmem>>, vector<1x128xf32>
    %4 = vector.broadcast %3 : vector<1x128xf32> to vector<8x128xf32>
    %5 = arith.addf %2, %4 : vector<8x128xf32>
    %6 = arith.mulf %5, %5 : vector<8x128xf32>
    %7 = arith.mulf %6, %5 : vector<8x128xf32>
    %c0_5 = arith.constant 0 : index
    %c0_6 = arith.constant 0 : index
    %8 = vector.load %arg5[%c0_5, %c0_6] : memref<8x128xf32, #tpu.memory_space<vmem>>, vector<8x128xf32>
    tpu.vector_store %arg5[%c0_5, %c0_6], %7 {strides = array<i32>} : memref<8x128xf32, #tpu.memory_space<vmem>>, vector<8x128xf32>,
    return
  }
  func.func @transform_0(%arg0: i32, %arg1: i32) -> (i32, i32) {
    %c0_i32 = arith.constant 0 : i32
    %c0_i32_0 = arith.constant 0 : i32
    return %arg1, %c0_i32 : i32, i32
  }
  func.func @transform_1(%arg0: i32, %arg1: i32) -> (i32, i32) {
    %c0_i32 = arith.constant 0 : i32
    %c0_i32_0 = arith.constant 0 : i32
    return %arg0, %c0_i32 : i32, i32
  }
  func.func @transform_2(%arg0: i32, %arg1: i32) -> (i32, i32) {
    %c0_i32 = arith.constant 0 : i32
    %c0_i32_0 = arith.constant 0 : i32
    return %c0_i32, %arg0 : i32, i32
  }
  func.func @transform_3(%arg0: i32, %arg1: i32) -> (i32, i32) {
    %c0_i32 = arith.constant 0 : i32
    return %arg1, %arg0 : i32, i32
  }
}

</mosaic_0001>

<bundles_post_ra>
// kernel: nonlinear_classifier_fwd.1
= control target key start
LH: loop header
LB: loop body
LE: loop exit
PB: predicated region body
PF: predicated region fallthrough
CT: control target
= control target key end

     0   :  { %8 = vsyncpa [#allocation3], 0  ;;  %s266_s0 = inlined_call_operand.vmem [shape: bf16[8,128], index: 0, kind: input, shape index: {}]   ;;  %s267_s1 = inlined_call_operand.hbm [shape: bf16[128,128], index: 1, kind: input, shape index: {}]   ;;  %s268_s2 = inlined_call_operand.vmem [shape: f32[1,128], index: 2, kind: input, shape index: {}]   ;;  %s269_s3 = inlined_call_operand.hbm [shape: f32[8,128], index: 3, kind: output, shape index: {}]  }
   0x1   :  { %9 = vsyncpa [#allocation4], 0  ;;  %s16_s14 = sshll.u32 %s267_s1, 4  ;;  %s230_s15 = smov [#allocation2]   ;;  %s17_s14 = int_to_ptr.hbm [resolvable:$true] %s16_s14 }
   0x2   :  { %s18_s16 = sshll.u32 %s230_s15, 4  ;;  %s231_s17 = smov 64   ;;  %s19_s16 = int_to_ptr.vmem [resolvable:$true] %s18_s16 }
   0x3   :  { %s232_s18 = smov 4  }
   0x4   :  { %24 = dma.hbm_to_vmem [thread:$0]  %s17_s14, 1024, %s19_s16, [#allocation3], %s231_s17, %s231_s17, %s232_s18  }
   0x5   :  { %226 = dma.done.wait [#allocation3], 1024  }
   0x6   :  { %227 = vsyncadd [#allocation3], 4294966272  ;;  %v172_v0 = vld [vmem:[#allocation2 + $0x38] sm:$0xff]  ;;  %v171_v1 = vld [vmem:[#allocation2 + $0x30] sm:$0xff]  ;;  %s233_s22 = smov [#allocation5]   ;;  %s123_s26 = sshll.u32 %s269_s3, 4  ;;  %s124_s26 = int_to_ptr.hbm [resolvable:$true] %s123_s26 }
   0x7   :  { %100 = vmatpush.bf16.xpose.msra.mxu0 %v172_v0  ;;  %v170_v2 = vld [vmem:[#allocation2 + $0x28] sm:$0xff]  ;;  %v169_v3 = vld [vmem:[#allocation2 + $0x20] sm:$0xff]  ;;  %v168_v4 = vld [vmem:[#allocation2 + $0x18] sm:$0xff]  ;;  %s121_s23 = sshll.u32 %s233_s22, 4  ;;  %s122_s23 = int_to_ptr.vmem [resolvable:$true] %s121_s23 }
   0x8   :  { %v167_v5 = vld [vmem:[#allocation2 + $0x10] sm:$0xff]  ;;  %v166_v6 = vld [vmem:[#allocation2 + $0x8] sm:$0xff]  ;;  %v165_v7 = vld [vmem:[#allocation2] sm:$0xff] }
   0x9   :  { %v31_v8 = vld [vmem:[%s266_s0] sm:$0xf] }
   0xa   :  { %v177_v9 = vld [vmem:[%s268_s2] ss:$0 sm:$0xff] }
   0xf   :  { %101 = vmatpush.bf16.xpose.msra.mxu0 %v171_v1 }
  0x17   :  { %102 = vmatpush.bf16.xpose.msra.mxu0 %v170_v2 }
  0x1f   :  { %103 = vmatpush.bf16.xpose.msra.mxu0 %v169_v3 }
  0x27   :  { %104 = vmatpush.bf16.xpose.msra.mxu0 %v168_v4 }
  0x2f   :  { %105 = vmatpush.bf16.xpose.msra.mxu0 %v167_v5 }
  0x37   :  { %106 = vmatpush.bf16.xpose.msra.mxu0 %v166_v6 }
  0x3f   :  { %107 = vmatpush.bf16.xpose.msra.mxu0 %v165_v7 }
  0x46   :  { %108 = vmatmul.bf16.vlgmr.msra.gmra.mxu0 %v31_v8 }
  0xc3   :  { %v109_v10 = vpop.f32.mrf.mxu0 }
  0xc4   :  { %v110_v11 = vadd.f32 %v177_v9, %v109_v10 }
  0xc6   :  { %v113_v12 = vmul.f32 %v110_v11, %v110_v11 }
  0xc8   :  { %v114_v13 = vmul.f32 %v113_v12, %v110_v11 }
  0xca   :  { %115 = vst [vmem:[#allocation5] sm:$0xff] %v114_v13 }
  0xcb   :  { %v111_v14 = vpop.f32.mrf.mxu0  ;;  %126 = dma.vmem_to_hbm [thread:$0]  %s122_s23, 128, %s124_s26, [#allocation4]  }
  0xcc   :  { %228 = dma.done.wait [#allocation4], 128  }
  0xcd   :  { %229 = vsyncadd [#allocation4], 4294967168 }
  0xce   :  { %131 = vsyncpa [#allocation3], 1 }
  0xcf   :  { %132 = vsyncpa [#allocation4], 1 }

</bundles_post_ra>
